<compile_context>
chip_gen: v5e
topology: v5e:2x2
jax: 0.10.0
libtpu: 0.0.40
codegen_flags: <defaults>
</compile_context>

<pallas_src>
import functools

import jax
import jax.numpy as jnp
from jax.experimental import pallas as pl
from jax.experimental.pallas import tpu as pltpu


def _round_up(x: int, m: int) -> int:
    return ((x + m - 1) // m) * m


def _vmem_capacity_bytes() -> int:
    """Physical VMEM of the local chip; conservative 64 MiB fallback."""
    try:
        return int(pltpu.get_tpu_info().vmem_capacity_bytes)
    except Exception:
        return 64 << 20


def _mlp_kernel(x_ref, wgu_ref, wd_ref, o_ref, acc_ref, *, tn: int):
    """One grid step: row tile i, intermediate tile j.

    x_ref  : (tm, n_embd)        activation rows (resident across j)
    wgu_ref: (n_embd, 2*tn)      [gate_j | up_j] fused projection slice
    wd_ref : (tn, n_embd)        down_proj slice
    o_ref  : (tm, n_embd)        output tile (resident across j)
    acc_ref: (tm, n_embd) f32    accumulator scratch
    """
    j = pl.program_id(1)

    @pl.when(j == 0)
    def _():
        acc_ref[...] = jnp.zeros_like(acc_ref)

    x = x_ref[...]
    # Single fused gate+up matmul on the MXU, f32 accumulation.
    gu = jnp.dot(x, wgu_ref[...], preferred_element_type=jnp.float32)
    gate = gu[:, :tn]
    up = gu[:, tn:]

    # SiLU(gate) * up in f32: exp and the (approx) reciprocal both go to the
    # EUP slot, leaving the VPU/ld-st slots free to co-issue with the MXU.
    sig = pl.reciprocal(1.0 + jnp.exp(-gate), approx=True)
    h = gate * sig * up

    # Partial down_proj for this intermediate slice; cast h back to the
    # activation dtype first (matches the PyTorch module, which materializes
    # the intermediate activation in the module dtype before down_proj).
    acc_ref[...] += jnp.dot(h.astype(x_ref.dtype), wd_ref[...],
                            preferred_element_type=jnp.float32)

    @pl.when(j == pl.num_programs(1) - 1)
    def _():
        o_ref[...] = acc_ref[...].astype(o_ref.dtype)


def qwen3_mlp(x: jax.Array,
              w_gate: jax.Array,
              w_up: jax.Array,
              w_down: jax.Array,
              *,
              tm: int | None = None,
              tn: int | None = None) -> jax.Array:
    """Fused SwiGLU MLP.

    x:       [..., n_embd]
    w_gate:  [n_embd, intermediate]   (= gate_proj.weight.T, bias=False)
    w_up:    [n_embd, intermediate]   (= up_proj.weight.T,   bias=False)
    w_down:  [intermediate, n_embd]   (= down_proj.weight.T, bias=False)
    """
    orig_shape = x.shape
    n_embd = orig_shape[-1]
    intermediate = w_gate.shape[1]

    rows = 1
    for s in orig_shape[:-1]:
        rows *= s
    x2d = x.reshape(rows, n_embd)

    act_sz = jnp.dtype(x.dtype).itemsize
    w_sz = jnp.dtype(w_gate.dtype).itemsize
    # Sublane packing of the activation dtype (8 for f32, 16 bf16, 32 int8).
    sublane = {4: 8, 2: 16, 1: 32}.get(act_sz, 8)

    # ---- VMEM budget (generation aware) -----------------------------------
    vmem_phys = _vmem_capacity_bytes()
    if vmem_phys >= (100 << 20):
        # v5e / v6e: 128 MiB physical -> allow ~100 MiB scoped.
        vmem_cap = 100 << 20
    else:
        # v7x: 64 MiB physical -> leave headroom for compiler scratch.
        vmem_cap = max(min(vmem_phys - (12 << 20), 52 << 20), 32 << 20)
    tile_budget = vmem_cap - (4 << 20)

    # ---- Tile selection -----------------------------------------------------
    # tn: prefer 256 (full MXU tile on v6e/v7x, decent DMA row chunks), then
    # 512, then 128 (fine on v5e), else the whole intermediate dim.
    if tn is None:
        tn = next((c for c in (256, 512, 128) if intermediate % c == 0),
                  intermediate)
    if intermediate % tn != 0:
        raise ValueError(f"tn={tn} must divide intermediate={intermediate}")

    def vmem_need(tm_c: int) -> int:
        return (2 * tm_c * n_embd * act_sz          # x, double buffered
                + 2 * n_embd * (2 * tn) * w_sz      # fused gate|up, dbl buf
                + 2 * tn * n_embd * w_sz            # down_proj, dbl buf
                + 2 * tm_c * n_embd * act_sz        # output, double buffered
                + tm_c * n_embd * 4)                # f32 accumulator

    rows_cap = _round_up(rows, sublane)
    if tm is None:
        # Arithmetic intensity vs. the weight stream is exactly `tm`
        # flops/byte, so take the largest tm the VMEM budget allows.
        tm = sublane
        for cand in (1024, 768, 512, 384, 256, 192, 128, 96, 64, 32, 16, 8):
            c = _round_up(min(cand, rows_cap), sublane)
            if vmem_need(c) <= tile_budget:
                tm = c
                break
    else:
        tm = _round_up(tm, sublane)
        if vmem_need(tm) > tile_budget:
            raise ValueError(
                f"Requested tm={tm}, tn={tn} need {vmem_need(tm) >> 20} MiB "
                f"VMEM, exceeding the {tile_budget >> 20} MiB budget")

    rows_p = pl.cdiv(rows, tm) * tm
    if rows_p != rows:
        x2d = jnp.pad(x2d, ((0, rows_p - rows), (0, 0)))

    # Interleave-pack gate/up so grid step j sees one [gate_j | up_j] block of
    # width 2*tn (one RHS stream instead of two).  In a real model this pack
    # would be done once at weight-load time.
    n_j = intermediate // tn
    w_gu = jnp.concatenate(
        [w_gate.reshape(n_embd, n_j, tn), w_up.reshape(n_embd, n_j, tn)],
        axis=2).reshape(n_embd, 2 * intermediate)

    grid = (rows_p // tm, n_j)

    vmem_limit = int(min(max(vmem_need(tm) + (4 << 20), 32 << 20), vmem_cap))

    cost = pl.CostEstimate(
        flops=int(6 * rows * n_embd * intermediate),
        transcendentals=int(rows * intermediate),
        bytes_accessed=int(grid[0] * (w_gu.size * w_sz + w_down.size * w_sz)
                           + x2d.size * act_sz + rows_p * n_embd * act_sz),
    )

    # TODO(synk): v7x decode (rows <= tm) leaves one TensorCore idle; a
    # core-split of the intermediate (reduction) axis with a cross-core add of
    # partial accumulators would recover ~2x decode throughput there.
    out = pl.pallas_call(
        functools.partial(_mlp_kernel, tn=tn),
        out_shape=jax.ShapeDtypeStruct((rows_p, n_embd), x.dtype),
        grid_spec=pltpu.PrefetchScalarGridSpec(
            num_scalar_prefetch=0,
            grid=grid,
            in_specs=[
                pl.BlockSpec((tm, n_embd), lambda i, j: (i, 0)),      # x rows
                pl.BlockSpec((n_embd, 2 * tn), lambda i, j: (0, j)),  # gate|up
                pl.BlockSpec((tn, n_embd), lambda i, j: (j, 0)),      # down
            ],
            out_specs=pl.BlockSpec((tm, n_embd), lambda i, j: (i, 0)),
            scratch_shapes=[pltpu.VMEM((tm, n_embd), jnp.float32)],
        ),
        compiler_params=pltpu.CompilerParams(
            dimension_semantics=("parallel", "arbitrary"),
            vmem_limit_bytes=vmem_limit,
        ),
        cost_estimate=cost,
    )(x2d, w_gu, w_down)

    if rows_p != rows:
        out = out[:rows]
    return out.reshape(orig_shape)


if __name__ == "__main__":
    # Small shapes consistent with the module: batch=2, seq=8,
    # n_embd (hidden) = 32, intermediate = 64.
    batch, seq, n_embd, intermediate = 2, 8, 32, 64
    key = jax.random.PRNGKey(0)
    kx, kg, ku, kd = jax.random.split(key, 4)

    x = jax.random.normal(kx, (batch, seq, n_embd), dtype=jnp.float32)
    # Deterministic weights already in [in, out] layout (bias=False).
    w_gate = jax.random.normal(kg, (n_embd, intermediate), jnp.float32) / (n_embd ** 0.5)
    w_up = jax.random.normal(ku, (n_embd, intermediate), jnp.float32) / (n_embd ** 0.5)
    w_down = jax.random.normal(kd, (intermediate, n_embd), jnp.float32) / (intermediate ** 0.5)

    out = qwen3_mlp(x, w_gate, w_up, w_down)
    out = jax.block_until_ready(out)

    # Plain-JAX reference (same math as the PyTorch module):
    #   down_proj( SiLU(gate_proj(x)) * up_proj(x) )
    hp = jax.lax.Precision.HIGHEST
    gate = jnp.dot(x, w_gate, precision=hp)
    up = jnp.dot(x, w_up, precision=hp)
    ref = jnp.dot(gate * (1.0 / (1.0 + jnp.exp(-gate))) * up, w_down, precision=hp)

    assert out.shape == ref.shape
    assert jnp.allclose(out, ref, atol=1e-2, rtol=1e-2), "mismatch vs reference"

    print("KERNEL_OK")
</pallas_src>

<mosaic_0001>
module attributes {stable_mosaic.version = 11 : i64} {
  func.func @_mlp_kernel(%arg0: i32, %arg1: i32, %arg2: memref<16x32xf32, #tpu.memory_space<vmem>>, %arg3: memref<32x128xf32, #tpu.memory_space<vmem>>, %arg4: memref<64x32xf32, #tpu.memory_space<vmem>>, %arg5: memref<16x32xf32, #tpu.memory_space<vmem>>, %arg6: memref<16x32xf32, #tpu.memory_space<vmem>>) attributes {dimension_semantics = [#tpu.dimension_semantics<parallel>, #tpu.dimension_semantics<arbitrary>], iteration_bounds = array<i64: 1, 1>, scalar_prefetch = 0 : i64, scratch_operands = 1 : i64, tpu.core_type = #tpu.core_type<tc>, window_params = [{transform_indices = @transform_0, window_bounds = array<i64: 16, 32>}, {transform_indices = @transform_1, window_bounds = array<i64: 32, 128>}, {transform_indices = @transform_2, window_bounds = array<i64: 64, 32>}, {transform_indices = @transform_3, window_bounds = array<i64: 16, 32>}]} {
    %c0_i32 = arith.constant 0 : i32
    %0 = arith.cmpi eq, %arg1, %c0_i32 : i32
    %1 = arith.extui %0 : i1 to i32
    %c0_i32_0 = arith.constant 0 : i32
    %2 = arith.cmpi ne, %1, %c0_i32_0 : i32
    scf.if %2 {
      %cst_15 = arith.constant 0.000000e+00 : f32
      %24 = vector.broadcast %cst_15 : f32 to vector<16x32xf32>
      %c0_16 = arith.constant 0 : index
      %c0_17 = arith.constant 0 : index
      %25 = vector.load %arg6[%c0_16, %c0_17] : memref<16x32xf32, #tpu.memory_space<vmem>>, vector<16x32xf32>
      tpu.vector_store %arg6[%c0_16, %c0_17], %24 {strides = array<i32>} : memref<16x32xf32, #tpu.memory_space<vmem>>, vector<16x32xf32>,
    } else {
    }
    %c0 = arith.constant 0 : index
    %c0_1 = arith.constant 0 : index
    %3 = vector.load %arg2[%c0, %c0_1] : memref<16x32xf32, #tpu.memory_space<vmem>>, vector<16x32xf32>
    %c0_2 = arith.constant 0 : index
    %c0_3 = arith.constant 0 : index
    %4 = vector.load %arg3[%c0_2, %c0_3] : memref<32x128xf32, #tpu.memory_space<vmem>>, vector<32x128xf32>
    %cst = arith.constant dense<0.000000e+00> : vector<16x128xf32>
    %5 = tpu.matmul %3, %4, %cst {dimension_numbers = #tpu.dot_dimension_numbers<[1], [0], [0], [1], [0, 0, 1, 1], [], []>} : vector<16x32xf32>, vector<32x128xf32>, vector<16x128xf32> -> vector<16x128xf32>
    %6 = vector.extract_strided_slice %5 {offsets = [0, 0], sizes = [16, 64], strides = [1, 1]} : vector<16x128xf32> to vector<16x64xf32>
    %7 = vector.extract_strided_slice %5 {offsets = [0, 64], sizes = [16, 64], strides = [1, 1]} : vector<16x128xf32> to vector<16x64xf32>
    %cst_4 = arith.constant 0.000000e+00 : f32
    %8 = vector.broadcast %cst_4 : f32 to vector<16x64xf32>
    %9 = arith.subf %8, %6 : vector<16x64xf32>
    %10 = math.exp %9 : vector<16x64xf32>
    %cst_5 = arith.constant 1.000000e+00 : f32
    %11 = vector.broadcast %cst_5 : f32 to vector<16x64xf32>
    %12 = arith.addf %11, %10 : vector<16x64xf32>
    %13 = tpu.reciprocal %12 {approx = true} : vector<16x64xf32> -> vector<16x64xf32>
    %14 = arith.mulf %6, %13 : vector<16x64xf32>
    %15 = arith.mulf %14, %7 : vector<16x64xf32>
    %c0_6 = arith.constant 0 : index
    %c0_7 = arith.constant 0 : index
    %16 = vector.load %arg6[%c0_6, %c0_7] : memref<16x32xf32, #tpu.memory_space<vmem>>, vector<16x32xf32>
    %c0_8 = arith.constant 0 : index
    %c0_9 = arith.constant 0 : index
    %17 = vector.load %arg4[%c0_8, %c0_9] : memref<64x32xf32, #tpu.memory_space<vmem>>, vector<64x32xf32>
    %cst_10 = arith.constant dense<0.000000e+00> : vector<16x32xf32>
    %18 = tpu.matmul %15, %17, %cst_10 {dimension_numbers = #tpu.dot_dimension_numbers<[1], [0], [0], [1], [0, 0, 1, 1], [], []>} : vector<16x64xf32>, vector<64x32xf32>, vector<16x32xf32> -> vector<16x32xf32>
    %19 = arith.addf %16, %18 : vector<16x32xf32>
    %c0_11 = arith.constant 0 : index
    %c0_12 = arith.constant 0 : index
    %20 = vector.load %arg6[%c0_11, %c0_12] : memref<16x32xf32, #tpu.memory_space<vmem>>, vector<16x32xf32>
    tpu.vector_store %arg6[%c0_11, %c0_12], %19 {strides = array<i32>} : memref<16x32xf32, #tpu.memory_space<vmem>>, vector<16x32xf32>,
    %c0_i32_13 = arith.constant 0 : i32
    %21 = arith.cmpi eq, %arg1, %c0_i32_13 : i32
    %22 = arith.extui %21 : i1 to i32
    %c0_i32_14 = arith.constant 0 : i32
    %23 = arith.cmpi ne, %22, %c0_i32_14 : i32
    scf.if %23 {
      %c0_15 = arith.constant 0 : index
      %c0_16 = arith.constant 0 : index
      %24 = vector.load %arg6[%c0_15, %c0_16] : memref<16x32xf32, #tpu.memory_space<vmem>>, vector<16x32xf32>
      %c0_17 = arith.constant 0 : index
      %c0_18 = arith.constant 0 : index
      %25 = vector.load %arg5[%c0_17, %c0_18] : memref<16x32xf32, #tpu.memory_space<vmem>>, vector<16x32xf32>
      tpu.vector_store %arg5[%c0_17, %c0_18], %24 {strides = array<i32>} : memref<16x32xf32, #tpu.memory_space<vmem>>, vector<16x32xf32>,
    } else {
    }
    return
  }
  func.func @transform_0(%arg0: i32, %arg1: i32) -> (i32, i32) {
    %c0_i32 = arith.constant 0 : i32
    %c0_i32_0 = arith.constant 0 : i32
    return %arg0, %c0_i32 : i32, i32
  }
  func.func @transform_1(%arg0: i32, %arg1: i32) -> (i32, i32) {
    %c0_i32 = arith.constant 0 : i32
    %c0_i32_0 = arith.constant 0 : i32
    return %c0_i32, %arg1 : i32, i32
  }
  func.func @transform_2(%arg0: i32, %arg1: i32) -> (i32, i32) {
    %c0_i32 = arith.constant 0 : i32
    %c0_i32_0 = arith.constant 0 : i32
    return %arg1, %c0_i32 : i32, i32
  }
  func.func @transform_3(%arg0: i32, %arg1: i32) -> (i32, i32) {
    %c0_i32 = arith.constant 0 : i32
    %c0_i32_0 = arith.constant 0 : i32
    return %arg0, %c0_i32 : i32, i32
  }
}

</mosaic_0001>

<bundles_post_ra>
// kernel: tpu_custom_call.1
= control target key start
LH: loop header
LB: loop body
LE: loop exit
PB: predicated region body
PF: predicated region fallthrough
CT: control target
= control target key end

     0   :  { %s282_s0 = inlined_call_operand.vmem [shape: f32[16,32], index: 0, kind: input, shape index: {}]   ;;  %s283_s1 = inlined_call_operand.vmem [shape: f32[32,128], index: 1, kind: input, shape index: {}]   ;;  %s284_s2 = inlined_call_operand.vmem [shape: f32[64,32], index: 2, kind: input, shape index: {}]   ;;  %s285_s3 = inlined_call_operand.hbm [shape: f32[16,32], index: 3, kind: output, shape index: {}]  }
   0x1   :  { %v27_v0 = vld [vmem:[%s283_s1 + $0x18] sm:$0xff]  ;;  %v26_v1 = vld [vmem:[%s283_s1 + $0x10] sm:$0xff]  ;;  %v25_v2 = vld [vmem:[%s283_s1 + $0x8] sm:$0xff] }
   0x2   :  { %47 = vmatpush.msra.mxu0 %v27_v0  ;;  %153 = vmatpush.msra.mxu3 %v27_v0 }
   0x3   :  { %8 = vsyncpa [#allocation4], 0  ;;  %v24_v3 = vld [vmem:[%s283_s1] sm:$0xff]  ;;  %vm19_vm0 = vcmask 261120   ;;  %v23_v5 = vld [vmem:[%s282_s0 + $0x8] sm:$0xff]  ;;  %s204_s9 = smov 64  }
   0x4   :  { %48 = vmatpush.msra.mxu0 %v26_v1  ;;  %154 = vmatpush.msra.mxu3 %v26_v1  ;;  %v22_v4 = vld [vmem:[%s282_s0] sm:$0xff]  ;;  %v89_v6 = vld [vmem:[%s284_s2 + $0x38] sm:$0xff]  ;;  %v88_v7 = vld [vmem:[%s284_s2 + $0x30] sm:$0xff]  ;;  %v205_v19 = vmov 0.0   ;;  %vm90_vm1 = vcmask 523264   ;;  %s137_s15 = sshll.u32 %s285_s3, 4  ;;  %s138_s15 = int_to_ptr.hbm [resolvable:$true] %s137_s15 }
   0x5   :  { %157 = vmatpush.msra.mxu2 %v89_v6  ;;  %105 = vmatpush.msra.mxu1 %v89_v6  ;;  %v87_v8 = vld [vmem:[%s284_s2 + $0x28] sm:$0xff]  ;;  %v86_v9 = vld [vmem:[%s284_s2 + $0x20] sm:$0xff]  ;;  %v85_v10 = vld [vmem:[%s284_s2 + $0x18] sm:$0xff]  ;;  %21 = vst.msk [vmem:[#allocation2 + $0x8] sm:$0xff] %vm19_vm0, %v205_v19  ;;  %s207_s16 = smov 128   ;;  %s208_s17 = smov 8  }
   0x6   :  { %49 = vmatpush.msra.mxu0 %v25_v2  ;;  %155 = vmatpush.msra.mxu3 %v25_v2  ;;  %v84_v11 = vld [vmem:[%s284_s2 + $0x10] sm:$0xff]  ;;  %v83_v12 = vld [vmem:[%s284_s2 + $0x8] sm:$0xff]  ;;  %v82_v16 = vld [vmem:[%s284_s2] sm:$0xff]  ;;  %20 = vst.msk [vmem:[#allocation2] sm:$0xff] %vm19_vm0, %v205_v19  ;;  %s206_s2 = smov [#allocation3]  }
   0x7   :  { %158 = vmatpush.msra.mxu2 %v88_v7  ;;  %106 = vmatpush.msra.mxu1 %v88_v7  ;;  %s135_s12 = sshll.u32 %s206_s2, 4  ;;  %s136_s12 = int_to_ptr.vmem [resolvable:$true] %s135_s12 }
   0x8   :  { %50 = vmatpush.msra.mxu0 %v24_v3  ;;  %156 = vmatpush.msra.mxu3 %v24_v3 }
   0x9   :  { %149 = vmatmul.msk.f32.vlgmr.msra.gmra.mxu0 %vm19_vm0, %v22_v4  ;;  %150 = vmatmul.msk.f32.vlgmr.msra.gmra.mxu3 %vm19_vm0, %v23_v5 }
   0xa   :  { %159 = vmatpush.msra.mxu2 %v87_v8  ;;  %107 = vmatpush.msra.mxu1 %v87_v8 }
   0xc   :  { %160 = vmatpush.msra.mxu2 %v86_v9  ;;  %108 = vmatpush.msra.mxu1 %v86_v9  ;;  %v81_v33 = vld [vmem:[#allocation2 + $0x8] sm:$0xff] }
   0xd   :  { %v80_v35 = vld [vmem:[#allocation2] sm:$0xff] }
   0xe   :  { %161 = vmatpush.msra.mxu2 %v85_v10  ;;  %109 = vmatpush.msra.mxu1 %v85_v10 }
  0x10   :  { %162 = vmatpush.msra.mxu2 %v84_v11  ;;  %110 = vmatpush.msra.mxu1 %v84_v11 }
  0x12   :  { %163 = vmatpush.msra.mxu2 %v83_v12  ;;  %111 = vmatpush.msra.mxu1 %v83_v12 }
  0x14   :  { %164 = vmatpush.msra.mxu2 %v82_v16  ;;  %112 = vmatpush.msra.mxu1 %v82_v16 }
  0x86   :  { %v52_v14 = vpop.f32.mrf.mxu0 }
  0x87   :  { %v58_v18 = vsub.f32 0.0, %v52_v14 }
  0x89   :  { %v60_v20 = vmul.f32 1.442695, %v58_v18 }
  0x8c   :  { %v55_v13 = vpop.f32.mrf.mxu3 }
  0x8d   :  { %74 = vrot.lane.b32.xlu0 %v55_v13, %s204_s9  ;;  %v59_v15 = vsub.f32 0.0, %v55_v13 }
  0x8f   :  { %v62_v17 = vmul.f32 1.442695, %v59_v15 }
  0x91   :  { %170 = vpow2.f32 %v62_v17 }
  0x92   :  { %172 = vpow2.f32 %v60_v20 }
  0x95   :  { %72 = vrot.lane.b32.xlu0 %v52_v14, %s204_s9 }
  0x97   :  { %v171_v21 = vpop.eup %170 }
  0x98   :  { %v65_v22 = vadd.f32 1.0, %v171_v21  ;;  %v173_v23 = vpop.eup %172 }
  0x99   :  { %v64_v24 = vadd.f32 1.0, %v173_v23 }
  0x9a   :  { %174 = vrcp.f32 %v65_v22 }
  0x9b   :  { %176 = vrcp.f32 %v64_v24 }
  0xa0   :  { %v175_v25 = vpop.eup %174 }
  0xa1   :  { %v69_v26 = vmul.f32 %v175_v25, %v55_v13  ;;  %v177_v29 = vpop.eup %176 }
  0xa2   :  { %v68_v30 = vmul.f32 %v177_v29, %v52_v14 }
  0xff   :  { %v75_v27 = vpop.permute.xlu0 %74 }
 0x100   :  { %v79_v28 = vmul.f32 %v75_v27, %v69_v26 }
 0x102   :  { %152 = vmatmul.msk.f32.vlgmr.msra.gmra.mxu2 %vm90_vm1, %v79_v28 }
 0x107   :  { %v73_v31 = vpop.permute.xlu0 %72 }
 0x108   :  { %v78_v32 = vmul.f32 %v73_v31, %v68_v30 }
 0x10a   :  { %151 = vmatmul.msk.f32.vlgmr.msra.gmra.mxu1 %vm90_vm1, %v78_v32 }
 0x185   :  { %v117_v34 = vpop.f32.mrf.mxu2 }
 0x186   :  { %v121_v36 = vadd.f32 %v117_v34, %v81_v33 }
 0x187   :  { %v114_v37 = vpop.f32.mrf.mxu1 }
 0x188   :  { %123 = vst.msk [vmem:[#allocation2 + $0x8] sm:$0xff] %vm19_vm0, %v121_v36  ;;  %v120_v38 = vadd.f32 %v114_v37, %v80_v35 }
 0x18a   :  { %122 = vst.msk [vmem:[#allocation2] sm:$0xff] %vm19_vm0, %v120_v38 }
 0x18f   :  { %v128_v39 = vld [vmem:[#allocation2 + $0x8] sm:$0xff] }
 0x190   :  { %130 = vst.msk [vmem:[#allocation3 + $0x8] sm:$0xff] %vm19_vm0, %v128_v39 }
 0x191   :  { %v127_v40 = vld [vmem:[#allocation2] sm:$0xff] }
 0x192   :  { %129 = vst.msk [vmem:[#allocation3] sm:$0xff] %vm19_vm0, %v127_v40 }
 0x193   :  { %143 = dma.vmem_to_hbm [thread:$0]  %s136_s12, 256, %s138_s15, [#allocation4], %s207_s16, %s207_s16, %s208_s17  }
 0x194   :  { %202 = dma.done.wait [#allocation4], 256  }
 0x195   :  { %203 = vsyncadd [#allocation4], 4294967040 }
 0x196   :  { %148 = vsyncpa [#allocation4], 1 }

</bundles_post_ra>
